<compile_context>
chip_gen: v7x
topology: tpu7x:2x2x1
jax: 0.10.0
libtpu: 0.0.40
codegen_flags: <defaults>
</compile_context>

<pallas_src>
import jax
import jax.numpy as jnp
from jax.experimental import pallas as pl
from jax.experimental.pallas import tpu as pltpu


LEAKY_SLOPE = 0.01   # nn.LeakyReLU default
BN_EPS = 1e-5        # nn.BatchNorm default
TB = 256             # batch tile (MXU-friendly M dim for large batches)


def _round_up(x, m):
    return ((x + m - 1) // m) * m


def _pad_to(a, shape):
    pads = [(0, s - d) for d, s in zip(a.shape, shape)]
    return jnp.pad(a, pads)


def mlp_m5_kernel(
    x_ref, t_ref,
    w0_ref, b0_ref,
    w1_ref, b1_ref,
    w2_ref, b2_ref,
    bn_ref,
    o_ref,
):
    x = x_ref[...]                       # (TB, D) f32
    t = t_ref[...]                       # (TB, 1) int32 domain ids
    tb = x.shape[0]
    domains_pad = bn_ref.shape[0]
    H = w0_ref.shape[1]                  # padded hidden width (128)

    # One-hot over (padded) domains, built on-chip (2-D iota required on TPU).
    dom_iota = jax.lax.broadcasted_iota(jnp.int32, (tb, domains_pad), 1)
    onehot = (t == dom_iota).astype(jnp.float32)          # (TB, Gp)

    # Single gather of all folded BN params: [scale0 | shift0 | scale1 | shift1]
    bn = jnp.dot(onehot, bn_ref[...], preferred_element_type=jnp.float32)
    scale0 = bn[:, 0 * H:1 * H]
    shift0 = bn[:, 1 * H:2 * H]
    scale1 = bn[:, 2 * H:3 * H]
    shift1 = bn[:, 3 * H:4 * H]

    def leaky_relu(z):
        return jnp.where(z >= 0, z, LEAKY_SLOPE * z)

    # layer_0 (bf16 MXU, f32 acc) -> LeakyReLU -> bn0 (folded scale/shift)
    h = jnp.dot(x.astype(jnp.bfloat16), w0_ref[...],
                preferred_element_type=jnp.float32) + b0_ref[...]
    h = scale0 * leaky_relu(h) + shift0

    # layer_1 -> LeakyReLU -> bn1
    h = jnp.dot(h.astype(jnp.bfloat16), w1_ref[...],
                preferred_element_type=jnp.float32) + b1_ref[...]
    h = scale1 * leaky_relu(h) + shift1

    # layer_3 (logits)
    out = jnp.dot(h.astype(jnp.bfloat16), w2_ref[...],
                  preferred_element_type=jnp.float32) + b2_ref[...]
    o_ref[...] = out.astype(o_ref.dtype)


def mlp_m5_forward(x, times, params, *, tb=TB):
    batch, data_shape = x.shape
    hidden = params["w0"].shape[1]
    out_shape = params["w2"].shape[1]
    domains = params["g0"].shape[0]

    D = _round_up(data_shape, 128)
    H = _round_up(hidden, 128)
    O = _round_up(out_shape, 128)
    G = _round_up(domains, 8)

    # Clamp the batch tile for tiny batches (avoids padding 8 -> 256 rows of
    # dead MXU work); second-minor block dim stays a multiple of 8.
    tb = min(tb, _round_up(max(batch, 1), 8))
    Bp = _round_up(max(batch, 1), tb)

    # --- pad inputs (padded rows use domain 0; they are sliced away) -------
    x_p = _pad_to(x.astype(jnp.float32), (Bp, D))
    t_p = _pad_to(times.astype(jnp.int32), (Bp, 1))

    # --- pad + bf16-cast weights, pad biases (f32) --------------------------
    w0 = _pad_to(params["w0"], (D, H)).astype(jnp.bfloat16)
    w1 = _pad_to(params["w1"], (H, H)).astype(jnp.bfloat16)
    w2 = _pad_to(params["w2"], (H, O)).astype(jnp.bfloat16)
    b0 = _pad_to(params["b0"], (1, H)).astype(jnp.float32)
    b1 = _pad_to(params["b1"], (1, H)).astype(jnp.float32)
    b2 = _pad_to(params["b2"], (1, O)).astype(jnp.float32)

    # --- fold BN into per-domain scale/shift; zero padding keeps padded
    #     hidden channels at exactly 0 after BN ------------------------------
    def fold(g, be, m, v):
        scale = g * jax.lax.rsqrt(v + BN_EPS)
        shift = be - m * scale
        return _pad_to(scale, (G, H)), _pad_to(shift, (G, H))

    s0, sh0 = fold(params["g0"], params["be0"], params["m0"], params["v0"])
    s1, sh1 = fold(params["g1"], params["be1"], params["m1"], params["v1"])
    bn_all = jnp.concatenate([s0, sh0, s1, sh1], axis=1)   # (G, 4*H) f32

    grid = (Bp // tb,)
    batch_map = lambda i: (i, 0)
    const_map = lambda i: (0, 0)

    out_p = pl.pallas_call(
        mlp_m5_kernel,
        out_shape=jax.ShapeDtypeStruct((Bp, O), jnp.float32),
        grid=grid,
        in_specs=[
            pl.BlockSpec((tb, D), batch_map),      # x
            pl.BlockSpec((tb, 1), batch_map),      # times
            pl.BlockSpec((D, H), const_map),       # w0 (VMEM-resident)
            pl.BlockSpec((1, H), const_map),       # b0
            pl.BlockSpec((H, H), const_map),       # w1
            pl.BlockSpec((1, H), const_map),       # b1
            pl.BlockSpec((H, O), const_map),       # w2
            pl.BlockSpec((1, O), const_map),       # b2
            pl.BlockSpec((G, 4 * H), const_map),   # folded BN params
        ],
        out_specs=pl.BlockSpec((tb, O), batch_map),
        compiler_params=pltpu.CompilerParams(
            dimension_semantics=("parallel",),
            vmem_limit_bytes=32 * 1024 * 1024,
        ),
    )(x_p, t_p, w0, b0, w1, b1, w2, b2, bn_all)

    return out_p[:batch, :out_shape]


def make_params(key, data_shape, hidden_shape, out_shape, domains):
    """Deterministic init mirroring the module's __init__ (kaiming normal
    weights, zero biases; GraphBN: gamma=1, beta=0, running mean=0, var=1)."""
    k0, k1, k2 = jax.random.split(key, 3)

    def kaiming(k, fan_in, fan_out):
        std = (2.0 / fan_in) ** 0.5
        # stored as (in, out) so the kernel computes x @ W
        return std * jax.random.normal(k, (fan_in, fan_out), jnp.float32)

    def bn_params(c):
        return (
            jnp.ones((domains, c), jnp.float32),   # gamma
            jnp.zeros((domains, c), jnp.float32),  # beta
            jnp.zeros((domains, c), jnp.float32),  # running mean
            jnp.ones((domains, c), jnp.float32),   # running var
        )

    g0, be0, m0, v0 = bn_params(hidden_shape)
    g1, be1, m1, v1 = bn_params(hidden_shape)

    return dict(
        w0=kaiming(k0, data_shape, hidden_shape),
        b0=jnp.zeros((1, hidden_shape), jnp.float32),
        g0=g0, be0=be0, m0=m0, v0=v0,
        w1=kaiming(k1, hidden_shape, hidden_shape),
        b1=jnp.zeros((1, hidden_shape), jnp.float32),
        g1=g1, be1=be1, m1=m1, v1=v1,
        w2=kaiming(k2, hidden_shape, out_shape),
        b2=jnp.zeros((1, out_shape), jnp.float32),
    )


def _reference_forward(x, times, params):
    """Pure-JAX reference (same folded-BN inference semantics)."""
    def leaky(z):
        return jnp.where(z >= 0, z, LEAKY_SLOPE * z)

    t = times[:, 0]

    def bn(h, g, be, m, v):
        scale = g * jax.lax.rsqrt(v + BN_EPS)
        shift = be - m * scale
        return scale[t] * h + shift[t]

    h = x @ params["w0"] + params["b0"]
    h = bn(leaky(h), params["g0"], params["be0"], params["m0"], params["v0"])
    h = h @ params["w1"] + params["b1"]
    h = bn(leaky(h), params["g1"], params["be1"], params["m1"], params["v1"])
    return h @ params["w2"] + params["b2"]


if __name__ == "__main__":
    # module defaults: data_shape=75, hidden_shape=50; small out_shape/domains.
    batch, data_shape, hidden_shape, out_shape, domains = 8, 75, 50, 3, 4

    key = jax.random.PRNGKey(0)
    kx, kt, kp = jax.random.split(key, 3)

    x = jax.random.normal(kx, (batch, data_shape), jnp.float32)
    times = jax.random.randint(kt, (batch, 1), 0, domains, jnp.int32)
    params = make_params(kp, data_shape, hidden_shape, out_shape, domains)

    out = mlp_m5_forward(x, times, params)
    jax.block_until_ready(out)

    assert out.shape == (batch, out_shape)
    assert bool(jnp.all(jnp.isfinite(out)))

    # correctness vs. pure-JAX reference (bf16 weight path -> loose tol)
    ref = _reference_forward(x, times, params)
    assert bool(jnp.all(jnp.abs(out - ref) < 5e-2)), "mismatch vs reference"

    print("KERNEL_OK")
</pallas_src>

<mosaic_0001>
module attributes {stable_mosaic.version = 11 : i64} {
  func.func @mlp_m5_kernel(%arg0: i32, %arg1: memref<8x128xf32, #tpu.memory_space<vmem>>, %arg2: memref<8x1xi32, #tpu.memory_space<vmem>>, %arg3: memref<128x128xbf16, #tpu.memory_space<vmem>>, %arg4: memref<1x128xf32, #tpu.memory_space<vmem>>, %arg5: memref<128x128xbf16, #tpu.memory_space<vmem>>, %arg6: memref<1x128xf32, #tpu.memory_space<vmem>>, %arg7: memref<128x128xbf16, #tpu.memory_space<vmem>>, %arg8: memref<1x128xf32, #tpu.memory_space<vmem>>, %arg9: memref<8x512xf32, #tpu.memory_space<vmem>>, %arg10: memref<8x128xf32, #tpu.memory_space<vmem>>) attributes {dimension_semantics = [#tpu.dimension_semantics<parallel>], iteration_bounds = array<i64: 1>, scalar_prefetch = 0 : i64, scratch_operands = 0 : i64, tpu.core_type = #tpu.core_type<tc>, window_params = [{transform_indices = @transform_0, window_bounds = array<i64: 8, 128>}, {transform_indices = @transform_1, window_bounds = array<i64: 8, 1>}, {pipeline_mode = #tpu.pipeline_mode<synchronous>, transform_indices = @transform_2, window_bounds = array<i64: 128, 128>}, {pipeline_mode = #tpu.pipeline_mode<synchronous>, transform_indices = @transform_3, window_bounds = array<i64: 1, 128>}, {pipeline_mode = #tpu.pipeline_mode<synchronous>, transform_indices = @transform_4, window_bounds = array<i64: 128, 128>}, {pipeline_mode = #tpu.pipeline_mode<synchronous>, transform_indices = @transform_5, window_bounds = array<i64: 1, 128>}, {pipeline_mode = #tpu.pipeline_mode<synchronous>, transform_indices = @transform_6, window_bounds = array<i64: 128, 128>}, {pipeline_mode = #tpu.pipeline_mode<synchronous>, transform_indices = @transform_7, window_bounds = array<i64: 1, 128>}, {pipeline_mode = #tpu.pipeline_mode<synchronous>, transform_indices = @transform_8, window_bounds = array<i64: 8, 512>}, {transform_indices = @transform_9, window_bounds = array<i64: 8, 128>}]} {
    %c0 = arith.constant 0 : index
    %c0_0 = arith.constant 0 : index
    %0 = vector.load %arg1[%c0, %c0_0] : memref<8x128xf32, #tpu.memory_space<vmem>>, vector<8x128xf32>
    %c0_1 = arith.constant 0 : index
    %c0_2 = arith.constant 0 : index
    %1 = vector.load %arg2[%c0_1, %c0_2] : memref<8x1xi32, #tpu.memory_space<vmem>>, vector<8x1xi32>
    %2 = tpu.iota {dimensions = array<i32: 1>} : vector<8x8xi32>
    %3 = vector.broadcast %1 : vector<8x1xi32> to vector<8x8xi32>
    %4 = arith.cmpi eq, %3, %2 : vector<8x8xi32>
    %5 = arith.extui %4 : vector<8x8xi1> to vector<8x8xi32>
    %6 = arith.sitofp %5 : vector<8x8xi32> to vector<8x8xf32>
    %c0_3 = arith.constant 0 : index
    %c0_4 = arith.constant 0 : index
    %7 = vector.load %arg9[%c0_3, %c0_4] : memref<8x512xf32, #tpu.memory_space<vmem>>, vector<8x512xf32>
    %cst = arith.constant dense<0.000000e+00> : vector<8x512xf32>
    %8 = tpu.matmul %6, %7, %cst {dimension_numbers = #tpu.dot_dimension_numbers<[1], [0], [0], [1], [0, 0, 1, 1], [], []>} : vector<8x8xf32>, vector<8x512xf32>, vector<8x512xf32> -> vector<8x512xf32>
    %9 = vector.extract_strided_slice %8 {offsets = [0, 0], sizes = [8, 128], strides = [1, 1]} : vector<8x512xf32> to vector<8x128xf32>
    %10 = vector.extract_strided_slice %8 {offsets = [0, 128], sizes = [8, 128], strides = [1, 1]} : vector<8x512xf32> to vector<8x128xf32>
    %11 = vector.extract_strided_slice %8 {offsets = [0, 256], sizes = [8, 128], strides = [1, 1]} : vector<8x512xf32> to vector<8x128xf32>
    %12 = vector.extract_strided_slice %8 {offsets = [0, 384], sizes = [8, 128], strides = [1, 1]} : vector<8x512xf32> to vector<8x128xf32>
    %13 = arith.truncf %0 : vector<8x128xf32> to vector<8x128xbf16>
    %c0_5 = arith.constant 0 : index
    %c0_6 = arith.constant 0 : index
    %14 = vector.load %arg3[%c0_5, %c0_6] : memref<128x128xbf16, #tpu.memory_space<vmem>>, vector<128x128xbf16>
    %cst_7 = arith.constant dense<0.000000e+00> : vector<8x128xf32>
    %15 = tpu.matmul %13, %14, %cst_7 {dimension_numbers = #tpu.dot_dimension_numbers<[1], [0], [0], [1], [0, 0, 1, 1], [], []>} : vector<8x128xbf16>, vector<128x128xbf16>, vector<8x128xf32> -> vector<8x128xf32>
    %c0_8 = arith.constant 0 : index
    %c0_9 = arith.constant 0 : index
    %16 = vector.load %arg4[%c0_8, %c0_9] : memref<1x128xf32, #tpu.memory_space<vmem>>, vector<1x128xf32>
    %17 = vector.broadcast %16 : vector<1x128xf32> to vector<8x128xf32>
    %18 = arith.addf %15, %17 : vector<8x128xf32>
    %cst_10 = arith.constant 0.000000e+00 : f32
    %19 = vector.broadcast %cst_10 : f32 to vector<8x128xf32>
    %20 = arith.cmpf oge, %18, %19 : vector<8x128xf32>
    %cst_11 = arith.constant 0.00999999977 : f32
    %21 = vector.broadcast %cst_11 : f32 to vector<8x128xf32>
    %22 = arith.mulf %21, %18 : vector<8x128xf32>
    %23 = arith.select %20, %18, %22 : vector<8x128xi1>, vector<8x128xf32>
    %24 = arith.mulf %9, %23 : vector<8x128xf32>
    %25 = arith.addf %24, %10 : vector<8x128xf32>
    %26 = arith.truncf %25 : vector<8x128xf32> to vector<8x128xbf16>
    %c0_12 = arith.constant 0 : index
    %c0_13 = arith.constant 0 : index
    %27 = vector.load %arg5[%c0_12, %c0_13] : memref<128x128xbf16, #tpu.memory_space<vmem>>, vector<128x128xbf16>
    %cst_14 = arith.constant dense<0.000000e+00> : vector<8x128xf32>
    %28 = tpu.matmul %26, %27, %cst_14 {dimension_numbers = #tpu.dot_dimension_numbers<[1], [0], [0], [1], [0, 0, 1, 1], [], []>} : vector<8x128xbf16>, vector<128x128xbf16>, vector<8x128xf32> -> vector<8x128xf32>
    %c0_15 = arith.constant 0 : index
    %c0_16 = arith.constant 0 : index
    %29 = vector.load %arg6[%c0_15, %c0_16] : memref<1x128xf32, #tpu.memory_space<vmem>>, vector<1x128xf32>
    %30 = vector.broadcast %29 : vector<1x128xf32> to vector<8x128xf32>
    %31 = arith.addf %28, %30 : vector<8x128xf32>
    %cst_17 = arith.constant 0.000000e+00 : f32
    %32 = vector.broadcast %cst_17 : f32 to vector<8x128xf32>
    %33 = arith.cmpf oge, %31, %32 : vector<8x128xf32>
    %cst_18 = arith.constant 0.00999999977 : f32
    %34 = vector.broadcast %cst_18 : f32 to vector<8x128xf32>
    %35 = arith.mulf %34, %31 : vector<8x128xf32>
    %36 = arith.select %33, %31, %35 : vector<8x128xi1>, vector<8x128xf32>
    %37 = arith.mulf %11, %36 : vector<8x128xf32>
    %38 = arith.addf %37, %12 : vector<8x128xf32>
    %39 = arith.truncf %38 : vector<8x128xf32> to vector<8x128xbf16>
    %c0_19 = arith.constant 0 : index
    %c0_20 = arith.constant 0 : index
    %40 = vector.load %arg7[%c0_19, %c0_20] : memref<128x128xbf16, #tpu.memory_space<vmem>>, vector<128x128xbf16>
    %cst_21 = arith.constant dense<0.000000e+00> : vector<8x128xf32>
    %41 = tpu.matmul %39, %40, %cst_21 {dimension_numbers = #tpu.dot_dimension_numbers<[1], [0], [0], [1], [0, 0, 1, 1], [], []>} : vector<8x128xbf16>, vector<128x128xbf16>, vector<8x128xf32> -> vector<8x128xf32>
    %c0_22 = arith.constant 0 : index
    %c0_23 = arith.constant 0 : index
    %42 = vector.load %arg8[%c0_22, %c0_23] : memref<1x128xf32, #tpu.memory_space<vmem>>, vector<1x128xf32>
    %43 = vector.broadcast %42 : vector<1x128xf32> to vector<8x128xf32>
    %44 = arith.addf %41, %43 : vector<8x128xf32>
    %c0_24 = arith.constant 0 : index
    %c0_25 = arith.constant 0 : index
    %45 = vector.load %arg10[%c0_24, %c0_25] : memref<8x128xf32, #tpu.memory_space<vmem>>, vector<8x128xf32>
    tpu.vector_store %arg10[%c0_24, %c0_25], %44 {strides = array<i32>} : memref<8x128xf32, #tpu.memory_space<vmem>>, vector<8x128xf32>,
    return
  }
  func.func @transform_0(%arg0: i32) -> (i32, i32) {
    %c0_i32 = arith.constant 0 : i32
    %c0_i32_0 = arith.constant 0 : i32
    return %arg0, %c0_i32 : i32, i32
  }
  func.func @transform_1(%arg0: i32) -> (i32, i32) {
    %c0_i32 = arith.constant 0 : i32
    %c0_i32_0 = arith.constant 0 : i32
    return %arg0, %c0_i32 : i32, i32
  }
  func.func @transform_2(%arg0: i32) -> (i32, i32) {
    %c0_i32 = arith.constant 0 : i32
    %c0_i32_0 = arith.constant 0 : i32
    %c0_i32_1 = arith.constant 0 : i32
    return %c0_i32, %c0_i32_0 : i32, i32
  }
  func.func @transform_3(%arg0: i32) -> (i32, i32) {
    %c0_i32 = arith.constant 0 : i32
    %c0_i32_0 = arith.constant 0 : i32
    %c0_i32_1 = arith.constant 0 : i32
    return %c0_i32, %c0_i32_0 : i32, i32
  }
  func.func @transform_4(%arg0: i32) -> (i32, i32) {
    %c0_i32 = arith.constant 0 : i32
    %c0_i32_0 = arith.constant 0 : i32
    %c0_i32_1 = arith.constant 0 : i32
    return %c0_i32, %c0_i32_0 : i32, i32
  }
  func.func @transform_5(%arg0: i32) -> (i32, i32) {
    %c0_i32 = arith.constant 0 : i32
    %c0_i32_0 = arith.constant 0 : i32
    %c0_i32_1 = arith.constant 0 : i32
    return %c0_i32, %c0_i32_0 : i32, i32
  }
  func.func @transform_6(%arg0: i32) -> (i32, i32) {
    %c0_i32 = arith.constant 0 : i32
    %c0_i32_0 = arith.constant 0 : i32
    %c0_i32_1 = arith.constant 0 : i32
    return %c0_i32, %c0_i32_0 : i32, i32
  }
  func.func @transform_7(%arg0: i32) -> (i32, i32) {
    %c0_i32 = arith.constant 0 : i32
    %c0_i32_0 = arith.constant 0 : i32
    %c0_i32_1 = arith.constant 0 : i32
    return %c0_i32, %c0_i32_0 : i32, i32
  }
  func.func @transform_8(%arg0: i32) -> (i32, i32) {
    %c0_i32 = arith.constant 0 : i32
    %c0_i32_0 = arith.constant 0 : i32
    %c0_i32_1 = arith.constant 0 : i32
    return %c0_i32, %c0_i32_0 : i32, i32
  }
  func.func @transform_9(%arg0: i32) -> (i32, i32) {
    %c0_i32 = arith.constant 0 : i32
    %c0_i32_0 = arith.constant 0 : i32
    return %arg0, %c0_i32 : i32, i32
  }
}

</mosaic_0001>

<bundles_post_ra>
// kernel: tpu_custom_call.1
= control target key start
LH: loop header
LB: loop body
LE: loop exit
PB: predicated region body
PF: predicated region fallthrough
CT: control target
= control target key end

     0   :  { %14 = vsyncpa [#allocation3], 0  ;;  %s1067_s0 = inlined_call_operand.hbm [shape: f32[8,128], index: 0, kind: input, shape index: {}]   ;;  %s1068_s1 = inlined_call_operand.vmem [shape: s32[8,1], index: 1, kind: input, shape index: {}]   ;;  %s1069_s2 = inlined_call_operand.hbm [shape: bf16[128,128], index: 2, kind: input, shape index: {}]   ;;  %s1070_s3 = inlined_call_operand.vmem [shape: f32[1,128], index: 3, kind: input, shape index: {}]   ;;  %s1071_s4 = inlined_call_operand.hbm [shape: bf16[128,128], index: 4, kind: input, shape index: {}]   ;;  %s1072_s5 = inlined_call_operand.vmem [shape: f32[1,128], index: 5, kind: input, shape index: {}]   ;;  %s1073_s6 = inlined_call_operand.hbm [shape: bf16[128,128], index: 6, kind: input, shape index: {}]   ;;  %s1074_s7 = inlined_call_operand.vmem [shape: f32[1,128], index: 7, kind: input, shape index: {}]   ;;  %s1075_s8 = inlined_call_operand.vmem [shape: f32[8,512], index: 8, kind: input, shape index: {}]   ;;  %s1076_s9 = inlined_call_operand.hbm [shape: f32[8,128], index: 9, kind: output, shape index: {}]  }
   0x1   :  { %15 = vsyncpa [#allocation6], 0 }
   0x2   :  { %16 = vsyncpa [#allocation9], 0 }
   0x3   :  { %17 = vsyncpa [#allocation4], 0  ;;  %s881_s30 = smov [#allocation5]   ;;  %s763_s13 = scalar_lea.hbm %s1069_s2, 1024 }
   0x4   :  { %s35_s10 = sshll.u32 %s881_s30, 4  ;;  %p764_p0 = scmp.ne.s32.totalorder %s1069_s2, %s763_s13  ;;  %s36_s10 = int_to_ptr.vmem [resolvable:$true] %s35_s10 }
   0x5   :  { %p767_p1 = scmp.lt.u32.totalorder %s763_s13, %s1069_s2 }
   0x7   :  { %p769_p2 = pnand %p767_p1, %p764_p0 }
   0x9   :  { %772 = shalt.err (!%p769_p2)
}
   0xa   :  { %s773_s18 = scalar_lea.vmem %s36_s10, 1024  ;;  %p778_p4 = scmp.lt.s32.totalorder %s36_s10, %s36_s10 }
   0xb   :  { %p774_p3 = scmp.ne.s32.totalorder %s36_s10, %s773_s18  ;;  %p779_p5 = scmp.lt.s32.totalorder %s773_s18, %s773_s18 }
   0xd   :  { %p780_p6 = por %p779_p5, %p778_p4 }
   0xf   :  { %p781_p7 = pnand %p780_p6, %p774_p3 }
  0x11   :  { %784 = shalt.err (!%p781_p7)
}
  0x12   :  { %s882_s19 = smov 64   ;;  %s883_s20 = smov 4  }
  0x13   :  { %41 = dma.hbm_to_vmem [thread:$0]  %s1069_s2, 1024, %s36_s10, [#allocation6], %s882_s19, %s882_s19, %s883_s20  }
  0x14   :  { %s884_s23 = smov [#allocation2]   ;;  %s885_s25 = smov [#allocation7]  }
  0x15   :  { %s24_s24 = sshll.u32 %s884_s23, 4  ;;  %s49_s26 = sshll.u32 %s885_s25, 4  ;;  %s25_s24 = int_to_ptr.vmem [resolvable:$true] %s24_s24  ;;  %s50_s26 = int_to_ptr.vmem [resolvable:$true] %s49_s26 }
  0x16   :  { %s785_s29 = scalar_lea.hbm %s1067_s0, 128 }
  0x17   :  { %p786_p8 = scmp.ne.s32.totalorder %s1067_s0, %s785_s29  ;;  %p789_p9 = scmp.lt.u32.totalorder %s785_s29, %s1067_s0 }
  0x19   :  { %p791_p10 = pnand %p789_p9, %p786_p8 }
  0x1b   :  { %794 = shalt.err (!%p791_p10)
}
  0x1c   :  { %s795_s2 = scalar_lea.vmem %s25_s24, 128  ;;  %p800_p12 = scmp.lt.s32.totalorder %s25_s24, %s25_s24 }
  0x1d   :  { %p796_p11 = scmp.ne.s32.totalorder %s25_s24, %s795_s2  ;;  %p801_p13 = scmp.lt.s32.totalorder %s795_s2, %s795_s2 }
  0x1f   :  { %p802_p0 = por %p801_p13, %p800_p12 }
  0x21   :  { %p803_p1 = pnand %p802_p0, %p796_p11 }
  0x23   :  { %806 = shalt.err (!%p803_p1)
}
  0x24   :  { %27 = dma.hbm_to_vmem [thread:$0]  %s1067_s0, 128, %s25_s24, [#allocation3]  }
  0x25   :  { %s807_s17 = scalar_lea.hbm %s1071_s4, 1024 }
  0x26   :  { %p808_p2 = scmp.ne.s32.totalorder %s1071_s4, %s807_s17  ;;  %p811_p3 = scmp.lt.u32.totalorder %s807_s17, %s1071_s4 }
  0x28   :  { %p813_p4 = pnand %p811_p3, %p808_p2 }
  0x2a   :  { %816 = shalt.err (!%p813_p4)
}
  0x2b   :  { %s817_s25 = scalar_lea.vmem %s50_s26, 1024  ;;  %p822_p6 = scmp.lt.s32.totalorder %s50_s26, %s50_s26 }
  0x2c   :  { %p818_p5 = scmp.ne.s32.totalorder %s50_s26, %s817_s25  ;;  %p823_p7 = scmp.lt.s32.totalorder %s817_s25, %s817_s25 }
  0x2e   :  { %p824_p8 = por %p823_p7, %p822_p6 }
  0x30   :  { %p825_p9 = pnand %p824_p8, %p818_p5 }
  0x32   :  { %828 = shalt.err (!%p825_p9)
}
  0x33   :  { %55 = dma.hbm_to_vmem [thread:$0]  %s1071_s4, 1024, %s50_s26, [#allocation6], %s882_s19, %s882_s19, %s883_s20  }
  0x34   :  { %s886_s27 = smov [#allocation8]   ;;  %s829_s11 = scalar_lea.hbm %s1073_s6, 1024 }
  0x35   :  { %s63_s28 = sshll.u32 %s886_s27, 4  ;;  %p830_p10 = scmp.ne.s32.totalorder %s1073_s6, %s829_s11  ;;  %s64_s28 = int_to_ptr.vmem [resolvable:$true] %s63_s28 }
  0x36   :  { %p833_p11 = scmp.lt.u32.totalorder %s829_s11, %s1073_s6 }
  0x38   :  { %p835_p12 = pnand %p833_p11, %p830_p10 }
  0x3a   :  { %838 = shalt.err (!%p835_p12)
}
  0x3b   :  { %s839_s14 = scalar_lea.vmem %s64_s28, 1024  ;;  %p844_p0 = scmp.lt.s32.totalorder %s64_s28, %s64_s28 }
  0x3c   :  { %p840_p13 = scmp.ne.s32.totalorder %s64_s28, %s839_s14  ;;  %p845_p1 = scmp.lt.s32.totalorder %s839_s14, %s839_s14 }
  0x3e   :  { %p846_p2 = por %p845_p1, %p844_p0 }
  0x40   :  { %p847_p3 = pnand %p846_p2, %p840_p13 }
  0x42   :  { %850 = shalt.err (!%p847_p3)
}
  0x43   :  { %69 = dma.hbm_to_vmem [thread:$0]  %s1073_s6, 1024, %s64_s28, [#allocation9], %s882_s19, %s882_s19, %s883_s20  }
  0x44   :  { %873 = dma.done.wait [#allocation3], 128  }
  0x45   :  { %874 = vsyncadd [#allocation3], 4294967168 }
  0x46   :  { %875 = dma.done.wait [#allocation6], 2048  }
  0x47   :  { %876 = vsyncadd [#allocation6], 4294965248 }
  0x48   :  { %877 = dma.done.wait [#allocation9], 1024  }
  0x49   :  { %878 = vsyncadd [#allocation9], 4294966272  ;;  %v887_v0 = vmov 0   ;;  %v888_v1 = vmov 0.0   ;;  %vm889_vm0 = vmmov 0   ;;  %v88_v2 = vld [vmem:[%s1068_s1] sm:$0xff]  ;;  %v89_v16 = vlaneseq }
  0x4a   :  { %738 = vset.pattern.permute.xlu0 %v887_v0  ;;  %668 = vmatprep.subr.bf16.mxu0 %v888_v1  ;;  %v739_v3 = vld [vmem:[#allocation5] sm:$0xff]   ;;  %v740_v4 = vld [vmem:[#allocation5 + $0x8] sm:$0xff]   ;;  %v741_v5 = vld [vmem:[#allocation5 + $0x10] sm:$0xff]   ;;  %vm101_vm1 = vcmask 64512   ;;  %s890_s27 = smov [#allocation10]  }
  0x4b   :  { %684 = vmatprep.mubr.msk.bf16.mxu0 %vm889_vm0, %v888_v1  ;;  %169 = vmatprep.mubr.f32.mxu1 %v888_v1  ;;  %v98_v6 = vld [vmem:[%s1075_s8 + $0x8] sm:$0xff]  ;;  %v97_v7 = vld [vmem:[%s1075_s8] sm:$0xff]  ;;  %v100_v8 = vld [vmem:[%s1075_s8 + $0x18] sm:$0xff]  ;;  %v90_v17 = vand.u32 127, %v89_v16  ;;  %s600_s28 = sshll.u32 %s890_s27, 4  ;;  %s601_s28 = int_to_ptr.vmem [resolvable:$true] %s600_s28 }
  0x4c   :  { %92 = vperm.xlu0 %738, %v88_v2   ;;  %669 = vmatpush3.bf16.msra.mxu0 %v739_v3  ;;  %v742_v9 = vld [vmem:[#allocation5 + $0x18] sm:$0xff]   ;;  %v743_v10 = vld [vmem:[#allocation5 + $0x20] sm:$0xff]   ;;  %v744_v11 = vld [vmem:[#allocation5 + $0x28] sm:$0xff]   ;;  %p856_p5 = scmp.lt.s32.totalorder %s601_s28, %s601_s28 }
  0x4d   :  { %670 = vmatprep.subr.bf16.mxu0 %v888_v1  ;;  %105 = vmatprep.subr.mxu1 %v98_v6  ;;  %v745_v12 = vld [vmem:[#allocation5 + $0x30] sm:$0xff]   ;;  %v746_v13 = vld [vmem:[#allocation5 + $0x38] sm:$0xff]   ;;  %v99_v19 = vld [vmem:[%s1075_s8 + $0x10] sm:$0xff] }
  0x4e   :  { %106 = vmatpush1.msra.mxu1 %v97_v7  ;;  %v87_v14 = vld [vmem:[#allocation2] sm:$0xff]  ;;  %v747_v21 = vld [vmem:[#allocation7] sm:$0xff]   ;;  %v748_v22 = vld [vmem:[#allocation7 + $0x8] sm:$0xff]  }
  0x4f   :  { %176 = vmatprep.subr.mxu1 %v100_v8  ;;  %v247_v15 = vpack.c.bf16 %v87_v14, %v87_v14  ;;  %v749_v23 = vld [vmem:[#allocation7 + $0x10] sm:$0xff]   ;;  %v750_v24 = vld [vmem:[#allocation7 + $0x18] sm:$0xff]   ;;  %v751_v25 = vld [vmem:[#allocation7 + $0x20] sm:$0xff]  }
  0x50   :  { %671 = vmatpush3.bf16.msra.mxu0 %v740_v4  ;;  %v752_v26 = vld [vmem:[#allocation7 + $0x28] sm:$0xff]   ;;  %v753_v27 = vld [vmem:[#allocation7 + $0x30] sm:$0xff]   ;;  %v754_v28 = vld [vmem:[#allocation7 + $0x38] sm:$0xff]  }
  0x51   :  { %672 = vmatprep.subr.bf16.mxu0 %v888_v1  ;;  %v755_v29 = vld [vmem:[#allocation8] sm:$0xff]   ;;  %v756_v30 = vld [vmem:[#allocation8 + $0x8] sm:$0xff]   ;;  %v757_v31 = vld [vmem:[#allocation8 + $0x10] sm:$0xff]  }
  0x52   :  { %v758_v32 = vld [vmem:[#allocation8 + $0x18] sm:$0xff]   ;;  %v759_v33 = vld [vmem:[#allocation8 + $0x20] sm:$0xff]   ;;  %v760_v49 = vld [vmem:[#allocation8 + $0x28] sm:$0xff]  }
  0x53   :  { %v614_v38 = vld [vmem:[%s1070_s3] ss:$0 sm:$0xff]  ;;  %v761_v50 = vld [vmem:[#allocation8 + $0x30] sm:$0xff]  }
  0x54   :  { %673 = vmatpush3.bf16.msra.mxu0 %v741_v5  ;;  %v762_v51 = vld [vmem:[#allocation8 + $0x38] sm:$0xff]  }
  0x55   :  { %674 = vmatprep.subr.bf16.mxu0 %v888_v1  ;;  %v623_v52 = vld [vmem:[%s1072_s5] ss:$0 sm:$0xff]  ;;  %s851_s5 = scalar_lea.vmem %s601_s28, 128 }
  0x56   :  { %v632_v63 = vld [vmem:[%s1074_s7] ss:$0 sm:$0xff]  ;;  %p852_p4 = scmp.ne.s32.totalorder %s601_s28, %s851_s5  ;;  %p857_p6 = scmp.lt.s32.totalorder %s851_s5, %s851_s5 }
  0x58   :  { %675 = vmatpush3.bf16.msra.mxu0 %v742_v9  ;;  %p858_p7 = por %p857_p6, %p856_p5 }
  0x59   :  { %676 = vmatprep.subr.bf16.mxu0 %v888_v1 }
  0x5a   :  { %p859_p8 = pnand %p858_p7, %p852_p4 }
  0x5c   :  { %677 = vmatpush3.bf16.msra.mxu0 %v743_v10 }
  0x5d   :  { %678 = vmatprep.subr.bf16.mxu0 %v888_v1 }
  0x60   :  { %679 = vmatpush3.bf16.msra.mxu0 %v744_v11 }
  0x61   :  { %680 = vmatprep.subr.bf16.mxu0 %v888_v1 }
  0x64   :  { %681 = vmatpush3.bf16.msra.mxu0 %v745_v12 }
  0x65   :  { %682 = vmatprep.subr.bf16.mxu0 %v888_v1 }
  0x68   :  { %683 = vmatpush3.bf16.msra.mxu0 %v746_v13 }
  0x69   :  { %708 = vmatprep.subr.bf16.mxu0 %v888_v1 }
  0x6b   :  { %685 = vmatmul.mubr.bf16.vlgmr.msra.gmra.mrb[0].mxu0 %v247_v15 }
  0x6c   :  { %724 = vmatprep.mubr.msk.bf16.mxu0 %vm889_vm0, %v888_v1  ;;  %709 = vmatpush3.bf16.msra.mxu0 %v755_v29 }
  0x6d   :  { %710 = vmatprep.subr.bf16.mxu0 %v888_v1 }
  0x70   :  { %711 = vmatpush3.bf16.msra.mxu0 %v756_v30 }
  0x71   :  { %712 = vmatprep.subr.bf16.mxu0 %v888_v1 }
  0x74   :  { %713 = vmatpush3.bf16.msra.mxu0 %v757_v31 }
  0x75   :  { %714 = vmatprep.subr.bf16.mxu0 %v888_v1 }
  0x78   :  { %715 = vmatpush3.bf16.msra.mxu0 %v758_v32 }
  0x79   :  { %716 = vmatprep.subr.bf16.mxu0 %v888_v1 }
  0x7c   :  { %717 = vmatpush3.bf16.msra.mxu0 %v759_v33 }
  0x7d   :  { %718 = vmatprep.subr.bf16.mxu0 %v888_v1 }
  0x80   :  { %719 = vmatpush3.bf16.msra.mxu0 %v760_v49 }
  0x81   :  { %720 = vmatprep.subr.bf16.mxu0 %v888_v1 }
  0x84   :  { %721 = vmatpush3.bf16.msra.mxu0 %v761_v50 }
  0x85   :  { %722 = vmatprep.subr.bf16.mxu0 %v888_v1 }
  0x88   :  { %723 = vmatpush3.bf16.msra.mxu0 %v762_v51 }
  0xcb   :  { %v93_v18 = vpop.permute.xlu0 %92 }
  0xcc   :  { %vm94_vm2 = vcmp.eq.s32.totalorder %v93_v18, %v90_v17 }
  0xcd   :  { %v611_v20 = vsel %vm94_vm2, 1.0, %v888_v1 }
  0xce   :  { %612 = vmatmul.mubr.msk.f32.vlgmr.msra.gmra.mrb[0].mxu1 %vm101_vm1, %v611_v20 }
  0xcf   :  { %177 = vmatpush1.msra.mxu1 %v99_v19  ;;  %240 = vmatprep.mubr.f32.mxu1 %v888_v1 }
  0xd0   :  { %688 = vmatprep.subr.bf16.mxu1 %v888_v1 }
  0xd2   :  { %613 = vmatmul.mubr.msk.f32.vlgmr.msra.gmra.mrb[2].mxu1 %vm101_vm1, %v611_v20 }
  0xd3   :  { %689 = vmatpush3.bf16.msra.mxu1 %v747_v21  ;;  %704 = vmatprep.mubr.msk.bf16.mxu1 %vm889_vm0, %v888_v1 }
  0xd4   :  { %690 = vmatprep.subr.bf16.mxu1 %v888_v1 }
  0xd7   :  { %691 = vmatpush3.bf16.msra.mxu1 %v748_v22 }
  0xd8   :  { %692 = vmatprep.subr.bf16.mxu1 %v888_v1 }
  0xdb   :  { %693 = vmatpush3.bf16.msra.mxu1 %v749_v23 }
  0xdc   :  { %694 = vmatprep.subr.bf16.mxu1 %v888_v1 }
  0xdf   :  { %695 = vmatpush3.bf16.msra.mxu1 %v750_v24 }
  0xe0   :  { %696 = vmatprep.subr.bf16.mxu1 %v888_v1 }
  0xe3   :  { %697 = vmatpush3.bf16.msra.mxu1 %v751_v25 }
  0xe4   :  { %698 = vmatprep.subr.bf16.mxu1 %v888_v1 }
  0xe7   :  { %699 = vmatpush3.bf16.msra.mxu1 %v752_v26 }
  0xe8   :  { %700 = vmatprep.subr.bf16.mxu1 %v888_v1 }
  0xeb   :  { %701 = vmatpush3.bf16.msra.mxu1 %v753_v27 }
  0xec   :  { %702 = vmatprep.subr.bf16.mxu1 %v888_v1 }
  0xef   :  { %703 = vmatpush3.bf16.msra.mxu1 %v754_v28 }
 0x13e   :  { %v353_v34 = vpop.f32.mrb[0].mxu0 }
 0x13f   :  { %v686_v35 = vpop.f32.mrb[1].mxu0  ;;  %v354_v39 = vadd.f32 %v614_v38, %v353_v34 }
 0x140   :  { %v356_v36 = vpop.f32.mrb[2].mxu0 }
 0x141   :  { %v687_v37 = vpop.f32.mrb[3].mxu0  ;;  %v360_v40 = vmul.f32 0.01, %v354_v39  ;;  %vm359_vm3 = vcmp.ge.f32.partialorder %v354_v39, 0.0 }
 0x143   :  { %v361_v42 = vsel %vm359_vm3, %v354_v39, %v360_v40 }
 0x1a1   :  { %v171_v41 = vpop.f32.mrb[0].mxu1 }
 0x1a2   :  { %v362_v43 = vmul.f32 %v361_v42, %v171_v41  ;;  %v173_v44 = vpop.f32.mrb[1].mxu1 }
 0x1a4   :  { %v363_v45 = vadd.f32 %v362_v43, %v173_v44 }
 0x1a5   :  { %v242_v46 = vpop.f32.mrb[2].mxu1 }
 0x1a6   :  { %v364_v47 = vpack.c.bf16 %v363_v45, %v363_v45  ;;  %v244_v48 = vpop.f32.mrb[3].mxu1 }
 0x1a8   :  { %705 = vmatmul.mubr.bf16.vlgmr.msra.gmra.mrb[4].mxu1 %v364_v47 }
 0x27b   :  { %v470_v53 = vpop.f32.mrb[4].mxu1 }
 0x27c   :  { %v471_v54 = vadd.f32 %v623_v52, %v470_v53  ;;  %v706_v55 = vpop.f32.mrb[5].mxu1 }
 0x27d   :  { %v473_v56 = vpop.f32.mrb[6].mxu1 }
 0x27e   :  { %vm476_vm4 = vcmp.ge.f32.partialorder %v471_v54, 0.0  ;;  %v477_v57 = vmul.f32 0.01, %v471_v54  ;;  %v707_v58 = vpop.f32.mrb[7].mxu1 }
 0x280   :  { %v478_v59 = vsel %vm476_vm4, %v471_v54, %v477_v57 }
 0x281   :  { %v479_v60 = vmul.f32 %v478_v59, %v242_v46 }
 0x283   :  { %v480_v61 = vadd.f32 %v479_v60, %v244_v48 }
 0x285   :  { %v481_v62 = vpack.c.bf16 %v480_v61, %v480_v61 }
 0x287   :  { %725 = vmatmul.mubr.bf16.vlgmr.msra.gmra.mrb[4].mxu0 %v481_v62 }
 0x35a   :  { %v587_v0 = vpop.f32.mrb[4].mxu0 }
 0x35b   :  { %v588_v1 = vadd.f32 %v632_v63, %v587_v0  ;;  %v726_v2 = vpop.f32.mrb[5].mxu0 }
 0x35c   :  { %v590_v3 = vpop.f32.mrb[6].mxu0 }
 0x35d   :  { %593 = vst [vmem:[#allocation10] sm:$0xff] %v588_v1  ;;  %v727_v4 = vpop.f32.mrb[7].mxu0 }
 0x35e   :  { %862 = shalt.err (!%p859_p8)
}
 0x35f   :  { %s863_s7 = scalar_lea.hbm %s1076_s9, 128 }
 0x360   :  { %p864_p9 = scmp.ne.s32.totalorder %s1076_s9, %s863_s7  ;;  %p867_p10 = scmp.lt.u32.totalorder %s863_s7, %s1076_s9 }
 0x362   :  { %p869_p11 = pnand %p867_p10, %p864_p9 }
 0x364   :  { %872 = shalt.err (!%p869_p11)
}
 0x365   :  { %603 = dma.vmem_to_hbm [thread:$0]  %s601_s28, 128, %s1076_s9, [#allocation4]  }
 0x366   :  { %879 = dma.done.wait [#allocation4], 128  }
 0x367   :  { %880 = vsyncadd [#allocation4], 4294967168 }
 0x368   :  { %607 = vsyncpa [#allocation3], 1 }
 0x369   :  { %608 = vsyncpa [#allocation6], 1 }
 0x36a   :  { %609 = vsyncpa [#allocation9], 1 }
 0x36b   :  { %610 = vsyncpa [#allocation4], 1 }

</bundles_post_ra>
